<compile_context>
chip_gen: v6e
topology: v6e:2x2x1
jax: 0.10.0
libtpu: 0.0.40
codegen_flags: <defaults>
</compile_context>

<pallas_src>
import functools
import math

import jax
import jax.numpy as jnp
from jax import lax
from jax.experimental import pallas as pl
from jax.experimental.pallas import tpu as pltpu

# Plain Python float -> becomes a jaxpr literal (NOT a captured jnp constant).
_INV_SQRT2 = float(1.0 / math.sqrt(2.0))


def _round_up(x: int, m: int) -> int:
    return (x + m - 1) // m * m


def _cdiv(a: int, b: int) -> int:
    return -(-a // b)


# --------------------------------------------------------------------------
# Kernel
# --------------------------------------------------------------------------
def _fused_mlp_kernel(*refs, num_layers: int):
    # refs = (x_ref, w0_ref, b0_ref, ..., w{L-1}_ref, b{L-1}_ref, o_ref)
    x_ref = refs[0]
    o_ref = refs[-1]
    wb_refs = refs[1:-1]

    h = x_ref[...].astype(jnp.float32)
    for i in range(num_layers):
        w = wb_refs[2 * i][...]        # bf16 [din_p, dout_p] (pre-transposed, padded)
        b = wb_refs[2 * i + 1][...]    # f32  [1, dout_p]
        # bf16 operands on the MXU, f32 accumulation.
        h = jnp.dot(h.astype(w.dtype), w, preferred_element_type=jnp.float32)
        h = h + b.astype(jnp.float32)
        if i != num_layers - 1:
            # exact erf GELU == torch.nn.GELU(approximate='none')
            h = 0.5 * h * (1.0 + lax.erf(h * _INV_SQRT2))
    o_ref[...] = h.astype(o_ref.dtype)


# --------------------------------------------------------------------------
# Parameter init / prep
# --------------------------------------------------------------------------
def init_mlp_params(key, input_dim, intermediate_dims, output_dim, use_bias=True,
                    dtype=jnp.float32):
    """Deterministic init mirroring nn.Linear shapes: W [out, in], b [out]."""
    dims = [input_dim] + list(intermediate_dims) + [output_dim]
    params = []
    for i in range(len(dims) - 1):
        fan_in, fan_out = dims[i], dims[i + 1]
        key, kw, kb = jax.random.split(key, 3)
        bound = 1.0 / math.sqrt(fan_in)
        w = jax.random.uniform(kw, (fan_out, fan_in), dtype, -bound, bound)
        if use_bias:
            b = jax.random.uniform(kb, (fan_out,), dtype, -bound, bound)
        else:
            b = jnp.zeros((fan_out,), dtype)
        params.append((w, b))
    return params


def prepare_mlp_params(params, weight_dtype=jnp.bfloat16):
    """One-time prep (outside the hot path):
      * transpose W to [in, out],
      * cast to bf16 (MXU-native on v5e/v6e/v7x; halves VMEM/HBM traffic),
      * zero-pad every feature dim to a multiple of 128 (lane-dense tiles).

    Zero padding is exact: padded input lanes hit zero weight rows, padded
    output lanes get 0 + 0 bias -> GELU(0) = 0, so they stay zero layer to
    layer.  Biases stay f32 (tiny) so bias add + GELU run in f32.
    """
    layers = []
    for (w, b) in params:
        dout, din = w.shape
        din_p = _round_up(din, 128)
        dout_p = _round_up(dout, 128)
        w_t = (jnp.zeros((din_p, dout_p), weight_dtype)
               .at[:din, :dout].set(w.T.astype(weight_dtype)))
        b_p = (jnp.zeros((1, dout_p), jnp.float32)
               .at[0, :dout].set(b.astype(jnp.float32)))
        layers.append((w_t, b_p))
    return {
        "layers": layers,
        "input_dim": params[0][0].shape[1],
        "output_dim": params[-1][0].shape[0],
    }


# --------------------------------------------------------------------------
# VMEM budgeting helpers (generation-aware)
# --------------------------------------------------------------------------
def _vmem_capacity_bytes() -> int:
    try:
        return int(pltpu.get_tpu_info().vmem_capacity_bytes)
    except Exception:
        return 64 * 1024 * 1024   # conservative fallback: v7x per-TC VMEM


def _vmem_footprint_bytes(tm, dims_p, layers, io_itemsize) -> int:
    # Single-buffered resident weights + f32 biases.
    weight_bytes = sum(w.size * w.dtype.itemsize + b.size * b.dtype.itemsize
                       for (w, b) in layers)
    # x / out tiles are double-buffered by the pipeline.
    io_bytes = 2 * tm * dims_p[0] * io_itemsize + 2 * tm * dims_p[-1] * io_itemsize
    # f32 intermediate-activation temporaries at the widest padded layer
    # (h, its bf16 copy, the matmul result) -> ~3 live copies, conservatively.
    act_bytes = 3 * tm * max(dims_p) * 4
    return weight_bytes + io_bytes + act_bytes


# --------------------------------------------------------------------------
# Forward
# --------------------------------------------------------------------------
def mlp_forward(x, prepared):
    """Fused MLP forward. x: [B, input_dim] -> [B, output_dim]."""
    layers = prepared["layers"]
    in_dim = prepared["input_dim"]
    out_dim = prepared["output_dim"]
    num_layers = len(layers)

    B, Din = x.shape
    assert Din == in_dim, f"expected input dim {in_dim}, got {Din}"

    d0_pad = layers[0][0].shape[0]
    dlast_pad = layers[-1][0].shape[1]
    dims_p = [d0_pad] + [w.shape[1] for (w, _) in layers]

    # --- M-tile selection ---------------------------------------------------
    if B < 256:
        tm = _round_up(B, 8)                    # single grid step
    elif B < 1024:
        tm = _round_up(_cdiv(B, 2), 8)          # >= 2 steps -> both v7x TCs busy
    else:
        tm = 512                                # large batches: big dense tiles

    cap = _vmem_capacity_bytes()
    budget = cap - (8 << 20)                    # leave compiler/pipeline headroom
    weight_bytes = sum(w.size * w.dtype.itemsize + b.size * b.dtype.itemsize
                       for (w, b) in layers)
    if weight_bytes > budget:
        # TODO(synk): K/N-tiled accumulator path for non-resident weights.
        raise ValueError("padded weights exceed the resident-weight VMEM budget; "
                         "needs the tiled K/N path")
    while tm > 8 and _vmem_footprint_bytes(tm, dims_p, layers, x.dtype.itemsize) > budget:
        tm = _round_up(tm // 2, 8)

    b_pad = _round_up(B, tm)
    grid = (b_pad // tm,)

    # --- host-side pad only when actually needed -----------------------------
    if (b_pad != B) or (d0_pad != Din):
        x_in = jnp.zeros((b_pad, d0_pad), x.dtype).at[:B, :Din].set(x)
    else:
        x_in = x

    flat_args = []
    for (w_t, b_p) in layers:
        flat_args.append(w_t)
        flat_args.append(b_p)

    footprint = _vmem_footprint_bytes(tm, dims_p, layers, x.dtype.itemsize)
    vmem_limit = int(min(cap - (4 << 20), max(footprint + (8 << 20), 24 << 20)))

    kernel = functools.partial(_fused_mlp_kernel, num_layers=num_layers)

    def build_call(single_buffer_weights: bool):
        in_specs = [pl.BlockSpec((tm, d0_pad), lambda i: (i, 0))]
        # Constant-index (resident) weights/biases gain nothing from double
        # buffering -> request a single buffer and halve their VMEM cost.
        wkw = ({"pipeline_mode": pl.Buffered(1)}
               if single_buffer_weights and hasattr(pl, "Buffered") else {})
        for (w_t, b_p) in layers:
            in_specs.append(pl.BlockSpec(w_t.shape, lambda i: (0, 0), **wkw))
            in_specs.append(pl.BlockSpec(b_p.shape, lambda i: (0, 0), **wkw))
        return pl.pallas_call(
            kernel,
            out_shape=jax.ShapeDtypeStruct((b_pad, dlast_pad), x.dtype),
            grid=grid,
            in_specs=in_specs,
            out_specs=pl.BlockSpec((tm, dlast_pad), lambda i: (i, 0)),
            compiler_params=pltpu.CompilerParams(
                dimension_semantics=("parallel",),
                vmem_limit_bytes=vmem_limit,
            ),
        )

    try:
        out_pad = build_call(True)(x_in, *flat_args)
    except Exception:
        # Fallback if this jax build rejects single-buffered specs.
        out_pad = build_call(False)(x_in, *flat_args)

    if (b_pad != B) or (dlast_pad != out_dim):
        return out_pad[:B, :out_dim]
    return out_pad


# --------------------------------------------------------------------------
# Pure-JAX reference (original, unpadded f32 params)
# --------------------------------------------------------------------------
def mlp_reference(x, params):
    n = len(params)
    h = x
    for i, (w, b) in enumerate(params):
        h = h @ w.T + b
        if i != n - 1:
            h = 0.5 * h * (1.0 + lax.erf(h / jnp.sqrt(2.0)))
    return h


if __name__ == "__main__":
    key = jax.random.PRNGKey(0)
    k_x, k_p = jax.random.split(key)

    batch = 8
    input_dim = 32
    intermediate_dims = [64, 128]
    output_dim = 16

    x = jax.random.normal(k_x, (batch, input_dim), jnp.float32)
    params = init_mlp_params(k_p, input_dim, intermediate_dims, output_dim,
                             use_bias=True)

    prepared = prepare_mlp_params(params)   # one-time: transpose + bf16 + pad

    out = jax.block_until_ready(mlp_forward(x, prepared))

    ref = mlp_reference(x, params)
    assert out.shape == (batch, output_dim)
    # Weights are fed to the MXU in bf16 (f32 accumulation), so tolerance vs.
    # the f32 reference is loosened accordingly.
    assert jnp.allclose(out, ref, atol=3e-2, rtol=3e-2), "mismatch vs reference"

    print("KERNEL_OK")
</pallas_src>

<mosaic_0001>
module attributes {stable_mosaic.version = 11 : i64} {
  func.func @_fused_mlp_kernel(%arg0: i32, %arg1: memref<8x128xf32, #tpu.memory_space<vmem>>, %arg2: memref<128x128xbf16, #tpu.memory_space<vmem>>, %arg3: memref<1x128xf32, #tpu.memory_space<vmem>>, %arg4: memref<128x128xbf16, #tpu.memory_space<vmem>>, %arg5: memref<1x128xf32, #tpu.memory_space<vmem>>, %arg6: memref<128x128xbf16, #tpu.memory_space<vmem>>, %arg7: memref<1x128xf32, #tpu.memory_space<vmem>>, %arg8: memref<8x128xf32, #tpu.memory_space<vmem>>) attributes {dimension_semantics = [#tpu.dimension_semantics<parallel>], iteration_bounds = array<i64: 1>, scalar_prefetch = 0 : i64, scratch_operands = 0 : i64, tpu.core_type = #tpu.core_type<tc>, window_params = [{transform_indices = @transform_0, window_bounds = array<i64: 8, 128>}, {pipeline_mode = #tpu.pipeline_mode<synchronous>, transform_indices = @transform_1, window_bounds = array<i64: 128, 128>}, {pipeline_mode = #tpu.pipeline_mode<synchronous>, transform_indices = @transform_2, window_bounds = array<i64: 1, 128>}, {pipeline_mode = #tpu.pipeline_mode<synchronous>, transform_indices = @transform_3, window_bounds = array<i64: 128, 128>}, {pipeline_mode = #tpu.pipeline_mode<synchronous>, transform_indices = @transform_4, window_bounds = array<i64: 1, 128>}, {pipeline_mode = #tpu.pipeline_mode<synchronous>, transform_indices = @transform_5, window_bounds = array<i64: 128, 128>}, {pipeline_mode = #tpu.pipeline_mode<synchronous>, transform_indices = @transform_6, window_bounds = array<i64: 1, 128>}, {transform_indices = @transform_7, window_bounds = array<i64: 8, 128>}]} {
    %c0 = arith.constant 0 : index
    %c0_0 = arith.constant 0 : index
    %0 = vector.load %arg1[%c0, %c0_0] : memref<8x128xf32, #tpu.memory_space<vmem>>, vector<8x128xf32>
    %c0_1 = arith.constant 0 : index
    %c0_2 = arith.constant 0 : index
    %1 = vector.load %arg2[%c0_1, %c0_2] : memref<128x128xbf16, #tpu.memory_space<vmem>>, vector<128x128xbf16>
    %c0_3 = arith.constant 0 : index
    %c0_4 = arith.constant 0 : index
    %2 = vector.load %arg3[%c0_3, %c0_4] : memref<1x128xf32, #tpu.memory_space<vmem>>, vector<1x128xf32>
    %3 = arith.truncf %0 : vector<8x128xf32> to vector<8x128xbf16>
    %cst = arith.constant dense<0.000000e+00> : vector<8x128xf32>
    %4 = tpu.matmul %3, %1, %cst {dimension_numbers = #tpu.dot_dimension_numbers<[1], [0], [0], [1], [0, 0, 1, 1], [], []>} : vector<8x128xbf16>, vector<128x128xbf16>, vector<8x128xf32> -> vector<8x128xf32>
    %5 = vector.broadcast %2 : vector<1x128xf32> to vector<8x128xf32>
    %6 = arith.addf %4, %5 : vector<8x128xf32>
    %cst_5 = arith.constant 5.000000e-01 : f32
    %7 = vector.broadcast %cst_5 : f32 to vector<8x128xf32>
    %8 = arith.mulf %7, %6 : vector<8x128xf32>
    %cst_6 = arith.constant 0.707106769 : f32
    %9 = vector.broadcast %cst_6 : f32 to vector<8x128xf32>
    %10 = arith.mulf %6, %9 : vector<8x128xf32>
    %11 = math.erf %10 : vector<8x128xf32>
    %cst_7 = arith.constant 1.000000e+00 : f32
    %12 = vector.broadcast %cst_7 : f32 to vector<8x128xf32>
    %13 = arith.addf %12, %11 : vector<8x128xf32>
    %14 = arith.mulf %8, %13 : vector<8x128xf32>
    %c0_8 = arith.constant 0 : index
    %c0_9 = arith.constant 0 : index
    %15 = vector.load %arg4[%c0_8, %c0_9] : memref<128x128xbf16, #tpu.memory_space<vmem>>, vector<128x128xbf16>
    %c0_10 = arith.constant 0 : index
    %c0_11 = arith.constant 0 : index
    %16 = vector.load %arg5[%c0_10, %c0_11] : memref<1x128xf32, #tpu.memory_space<vmem>>, vector<1x128xf32>
    %17 = arith.truncf %14 : vector<8x128xf32> to vector<8x128xbf16>
    %cst_12 = arith.constant dense<0.000000e+00> : vector<8x128xf32>
    %18 = tpu.matmul %17, %15, %cst_12 {dimension_numbers = #tpu.dot_dimension_numbers<[1], [0], [0], [1], [0, 0, 1, 1], [], []>} : vector<8x128xbf16>, vector<128x128xbf16>, vector<8x128xf32> -> vector<8x128xf32>
    %19 = vector.broadcast %16 : vector<1x128xf32> to vector<8x128xf32>
    %20 = arith.addf %18, %19 : vector<8x128xf32>
    %cst_13 = arith.constant 5.000000e-01 : f32
    %21 = vector.broadcast %cst_13 : f32 to vector<8x128xf32>
    %22 = arith.mulf %21, %20 : vector<8x128xf32>
    %cst_14 = arith.constant 0.707106769 : f32
    %23 = vector.broadcast %cst_14 : f32 to vector<8x128xf32>
    %24 = arith.mulf %20, %23 : vector<8x128xf32>
    %25 = math.erf %24 : vector<8x128xf32>
    %cst_15 = arith.constant 1.000000e+00 : f32
    %26 = vector.broadcast %cst_15 : f32 to vector<8x128xf32>
    %27 = arith.addf %26, %25 : vector<8x128xf32>
    %28 = arith.mulf %22, %27 : vector<8x128xf32>
    %c0_16 = arith.constant 0 : index
    %c0_17 = arith.constant 0 : index
    %29 = vector.load %arg6[%c0_16, %c0_17] : memref<128x128xbf16, #tpu.memory_space<vmem>>, vector<128x128xbf16>
    %c0_18 = arith.constant 0 : index
    %c0_19 = arith.constant 0 : index
    %30 = vector.load %arg7[%c0_18, %c0_19] : memref<1x128xf32, #tpu.memory_space<vmem>>, vector<1x128xf32>
    %31 = arith.truncf %28 : vector<8x128xf32> to vector<8x128xbf16>
    %cst_20 = arith.constant dense<0.000000e+00> : vector<8x128xf32>
    %32 = tpu.matmul %31, %29, %cst_20 {dimension_numbers = #tpu.dot_dimension_numbers<[1], [0], [0], [1], [0, 0, 1, 1], [], []>} : vector<8x128xbf16>, vector<128x128xbf16>, vector<8x128xf32> -> vector<8x128xf32>
    %33 = vector.broadcast %30 : vector<1x128xf32> to vector<8x128xf32>
    %34 = arith.addf %32, %33 : vector<8x128xf32>
    %c0_21 = arith.constant 0 : index
    %c0_22 = arith.constant 0 : index
    %35 = vector.load %arg8[%c0_21, %c0_22] : memref<8x128xf32, #tpu.memory_space<vmem>>, vector<8x128xf32>
    tpu.vector_store %arg8[%c0_21, %c0_22], %34 {strides = array<i32>} : memref<8x128xf32, #tpu.memory_space<vmem>>, vector<8x128xf32>,
    return
  }
  func.func @transform_0(%arg0: i32) -> (i32, i32) {
    %c0_i32 = arith.constant 0 : i32
    %c0_i32_0 = arith.constant 0 : i32
    return %arg0, %c0_i32 : i32, i32
  }
  func.func @transform_1(%arg0: i32) -> (i32, i32) {
    %c0_i32 = arith.constant 0 : i32
    %c0_i32_0 = arith.constant 0 : i32
    %c0_i32_1 = arith.constant 0 : i32
    return %c0_i32, %c0_i32_0 : i32, i32
  }
  func.func @transform_2(%arg0: i32) -> (i32, i32) {
    %c0_i32 = arith.constant 0 : i32
    %c0_i32_0 = arith.constant 0 : i32
    %c0_i32_1 = arith.constant 0 : i32
    return %c0_i32, %c0_i32_0 : i32, i32
  }
  func.func @transform_3(%arg0: i32) -> (i32, i32) {
    %c0_i32 = arith.constant 0 : i32
    %c0_i32_0 = arith.constant 0 : i32
    %c0_i32_1 = arith.constant 0 : i32
    return %c0_i32, %c0_i32_0 : i32, i32
  }
  func.func @transform_4(%arg0: i32) -> (i32, i32) {
    %c0_i32 = arith.constant 0 : i32
    %c0_i32_0 = arith.constant 0 : i32
    %c0_i32_1 = arith.constant 0 : i32
    return %c0_i32, %c0_i32_0 : i32, i32
  }
  func.func @transform_5(%arg0: i32) -> (i32, i32) {
    %c0_i32 = arith.constant 0 : i32
    %c0_i32_0 = arith.constant 0 : i32
    %c0_i32_1 = arith.constant 0 : i32
    return %c0_i32, %c0_i32_0 : i32, i32
  }
  func.func @transform_6(%arg0: i32) -> (i32, i32) {
    %c0_i32 = arith.constant 0 : i32
    %c0_i32_0 = arith.constant 0 : i32
    %c0_i32_1 = arith.constant 0 : i32
    return %c0_i32, %c0_i32_0 : i32, i32
  }
  func.func @transform_7(%arg0: i32) -> (i32, i32) {
    %c0_i32 = arith.constant 0 : i32
    %c0_i32_0 = arith.constant 0 : i32
    return %arg0, %c0_i32 : i32, i32
  }
}

module attributes {stable_mosaic.version = 11 : i64} {
  func.func @_fused_mlp_kernel(%arg0: i32, %arg1: memref<8x128xf32, #tpu.memory_space<vmem>>, %arg2: memref<128x128xbf16, #tpu.memory_space<vmem>>, %arg3: memref<1x128xf32, #tpu.memory_space<vmem>>, %arg4: memref<128x128xbf16, #tpu.memory_space<vmem>>, %arg5: memref<1x128xf32, #tpu.memory_space<vmem>>, %arg6: memref<128x128xbf16, #tpu.memory_space<vmem>>, %arg7: memref<1x128xf32, #tpu.memory_space<vmem>>, %arg8: memref<8x128xf32, #tpu.memory_space<vmem>>) attributes {dimension_semantics = [#tpu.dimension_semantics<parallel>], iteration_bounds = array<i64: 1>, scalar_prefetch = 0 : i64, scratch_operands = 0 : i64, tpu.core_type = #tpu.core_type<tc>, window_params = [{transform_indices = @transform_0, window_bounds = array<i64: 8, 128>}, {pipeline_mode = #tpu.pipeline_mode<synchronous>, transform_indices = @transform_1, window_bounds = array<i64: 128, 128>}, {pipeline_mode = #tpu.pipeline_mode<synchronous>, transform_indices = @transform_2, window_bounds = array<i64: 1, 128>}, {pipeline_mode = #tpu.pipeline_mode<synchronous>, transform_indices = @transform_3, window_bounds = array<i64: 128, 128>}, {pipeline_mode = #tpu.pipeline_mode<synchronous>, transform_indices = @transform_4, window_bounds = array<i64: 1, 128>}, {pipeline_mode = #tpu.pipeline_mode<synchronous>, transform_indices = @transform_5, window_bounds = array<i64: 128, 128>}, {pipeline_mode = #tpu.pipeline_mode<synchronous>, transform_indices = @transform_6, window_bounds = array<i64: 1, 128>}, {transform_indices = @transform_7, window_bounds = array<i64: 8, 128>}]} {
    %c0 = arith.constant 0 : index
    %c0_0 = arith.constant 0 : index
    %0 = vector.load %arg1[%c0, %c0_0] : memref<8x128xf32, #tpu.memory_space<vmem>>, vector<8x128xf32>
    %c0_1 = arith.constant 0 : index
    %c0_2 = arith.constant 0 : index
    %1 = vector.load %arg2[%c0_1, %c0_2] : memref<128x128xbf16, #tpu.memory_space<vmem>>, vector<128x128xbf16>
    %c0_3 = arith.constant 0 : index
    %c0_4 = arith.constant 0 : index
    %2 = vector.load %arg3[%c0_3, %c0_4] : memref<1x128xf32, #tpu.memory_space<vmem>>, vector<1x128xf32>
    %3 = arith.truncf %0 : vector<8x128xf32> to vector<8x128xbf16>
    %cst = arith.constant dense<0.000000e+00> : vector<8x128xf32>
    %4 = tpu.matmul %3, %1, %cst {dimension_numbers = #tpu.dot_dimension_numbers<[1], [0], [0], [1], [0, 0, 1, 1], [], []>} : vector<8x128xbf16>, vector<128x128xbf16>, vector<8x128xf32> -> vector<8x128xf32>
    %5 = vector.broadcast %2 : vector<1x128xf32> to vector<8x128xf32>
    %6 = arith.addf %4, %5 : vector<8x128xf32>
    %cst_5 = arith.constant 5.000000e-01 : f32
    %7 = vector.broadcast %cst_5 : f32 to vector<8x128xf32>
    %8 = arith.mulf %7, %6 : vector<8x128xf32>
    %cst_6 = arith.constant 0.707106769 : f32
    %9 = vector.broadcast %cst_6 : f32 to vector<8x128xf32>
    %10 = arith.mulf %6, %9 : vector<8x128xf32>
    %11 = math.erf %10 : vector<8x128xf32>
    %cst_7 = arith.constant 1.000000e+00 : f32
    %12 = vector.broadcast %cst_7 : f32 to vector<8x128xf32>
    %13 = arith.addf %12, %11 : vector<8x128xf32>
    %14 = arith.mulf %8, %13 : vector<8x128xf32>
    %c0_8 = arith.constant 0 : index
    %c0_9 = arith.constant 0 : index
    %15 = vector.load %arg4[%c0_8, %c0_9] : memref<128x128xbf16, #tpu.memory_space<vmem>>, vector<128x128xbf16>
    %c0_10 = arith.constant 0 : index
    %c0_11 = arith.constant 0 : index
    %16 = vector.load %arg5[%c0_10, %c0_11] : memref<1x128xf32, #tpu.memory_space<vmem>>, vector<1x128xf32>
    %17 = arith.truncf %14 : vector<8x128xf32> to vector<8x128xbf16>
    %cst_12 = arith.constant dense<0.000000e+00> : vector<8x128xf32>
    %18 = tpu.matmul %17, %15, %cst_12 {dimension_numbers = #tpu.dot_dimension_numbers<[1], [0], [0], [1], [0, 0, 1, 1], [], []>} : vector<8x128xbf16>, vector<128x128xbf16>, vector<8x128xf32> -> vector<8x128xf32>
    %19 = vector.broadcast %16 : vector<1x128xf32> to vector<8x128xf32>
    %20 = arith.addf %18, %19 : vector<8x128xf32>
    %cst_13 = arith.constant 5.000000e-01 : f32
    %21 = vector.broadcast %cst_13 : f32 to vector<8x128xf32>
    %22 = arith.mulf %21, %20 : vector<8x128xf32>
    %cst_14 = arith.constant 0.707106769 : f32
    %23 = vector.broadcast %cst_14 : f32 to vector<8x128xf32>
    %24 = arith.mulf %20, %23 : vector<8x128xf32>
    %25 = math.erf %24 : vector<8x128xf32>
    %cst_15 = arith.constant 1.000000e+00 : f32
    %26 = vector.broadcast %cst_15 : f32 to vector<8x128xf32>
    %27 = arith.addf %26, %25 : vector<8x128xf32>
    %28 = arith.mulf %22, %27 : vector<8x128xf32>
    %c0_16 = arith.constant 0 : index
    %c0_17 = arith.constant 0 : index
    %29 = vector.load %arg6[%c0_16, %c0_17] : memref<128x128xbf16, #tpu.memory_space<vmem>>, vector<128x128xbf16>
    %c0_18 = arith.constant 0 : index
    %c0_19 = arith.constant 0 : index
    %30 = vector.load %arg7[%c0_18, %c0_19] : memref<1x128xf32, #tpu.memory_space<vmem>>, vector<1x128xf32>
    %31 = arith.truncf %28 : vector<8x128xf32> to vector<8x128xbf16>
    %cst_20 = arith.constant dense<0.000000e+00> : vector<8x128xf32>
    %32 = tpu.matmul %31, %29, %cst_20 {dimension_numbers = #tpu.dot_dimension_numbers<[1], [0], [0], [1], [0, 0, 1, 1], [], []>} : vector<8x128xbf16>, vector<128x128xbf16>, vector<8x128xf32> -> vector<8x128xf32>
    %33 = vector.broadcast %30 : vector<1x128xf32> to vector<8x128xf32>
    %34 = arith.addf %32, %33 : vector<8x128xf32>
    %c0_21 = arith.constant 0 : index
    %c0_22 = arith.constant 0 : index
    %35 = vector.load %arg8[%c0_21, %c0_22] : memref<8x128xf32, #tpu.memory_space<vmem>>, vector<8x128xf32>
    tpu.vector_store %arg8[%c0_21, %c0_22], %34 {strides = array<i32>} : memref<8x128xf32, #tpu.memory_space<vmem>>, vector<8x128xf32>,
    return
  }
  func.func @transform_0(%arg0: i32) -> (i32, i32) {
    %c0_i32 = arith.constant 0 : i32
    %c0_i32_0 = arith.constant 0 : i32
    return %arg0, %c0_i32 : i32, i32
  }
  func.func @transform_1(%arg0: i32) -> (i32, i32) {
    %c0_i32 = arith.constant 0 : i32
    %c0_i32_0 = arith.constant 0 : i32
    %c0_i32_1 = arith.constant 0 : i32
    return %c0_i32, %c0_i32_0 : i32, i32
  }
  func.func @transform_2(%arg0: i32) -> (i32, i32) {
    %c0_i32 = arith.constant 0 : i32
    %c0_i32_0 = arith.constant 0 : i32
    %c0_i32_1 = arith.constant 0 : i32
    return %c0_i32, %c0_i32_0 : i32, i32
  }
  func.func @transform_3(%arg0: i32) -> (i32, i32) {
    %c0_i32 = arith.constant 0 : i32
    %c0_i32_0 = arith.constant 0 : i32
    %c0_i32_1 = arith.constant 0 : i32
    return %c0_i32, %c0_i32_0 : i32, i32
  }
  func.func @transform_4(%arg0: i32) -> (i32, i32) {
    %c0_i32 = arith.constant 0 : i32
    %c0_i32_0 = arith.constant 0 : i32
    %c0_i32_1 = arith.constant 0 : i32
    return %c0_i32, %c0_i32_0 : i32, i32
  }
  func.func @transform_5(%arg0: i32) -> (i32, i32) {
    %c0_i32 = arith.constant 0 : i32
    %c0_i32_0 = arith.constant 0 : i32
    %c0_i32_1 = arith.constant 0 : i32
    return %c0_i32, %c0_i32_0 : i32, i32
  }
  func.func @transform_6(%arg0: i32) -> (i32, i32) {
    %c0_i32 = arith.constant 0 : i32
    %c0_i32_0 = arith.constant 0 : i32
    %c0_i32_1 = arith.constant 0 : i32
    return %c0_i32, %c0_i32_0 : i32, i32
  }
  func.func @transform_7(%arg0: i32) -> (i32, i32) {
    %c0_i32 = arith.constant 0 : i32
    %c0_i32_0 = arith.constant 0 : i32
    return %arg0, %c0_i32 : i32, i32
  }
}

</mosaic_0001>

<bundles_post_ra>
// kernel: tpu_custom_call.1
= control target key start
LH: loop header
LB: loop body
LE: loop exit
PB: predicated region body
PF: predicated region fallthrough
CT: control target
= control target key end

     0   :  { %12 = vsyncpa [#allocation3], 0  ;;  %s817_s0 = inlined_call_operand.hbm [shape: f32[8,128], index: 0, kind: input, shape index: {}]   ;;  %s818_s1 = inlined_call_operand.hbm [shape: bf16[128,128], index: 1, kind: input, shape index: {}]   ;;  %s819_s2 = inlined_call_operand.vmem [shape: f32[1,128], index: 2, kind: input, shape index: {}]   ;;  %s820_s3 = inlined_call_operand.hbm [shape: bf16[128,128], index: 3, kind: input, shape index: {}]   ;;  %s821_s4 = inlined_call_operand.vmem [shape: f32[1,128], index: 4, kind: input, shape index: {}]   ;;  %s822_s5 = inlined_call_operand.hbm [shape: bf16[128,128], index: 5, kind: input, shape index: {}]   ;;  %s823_s6 = inlined_call_operand.vmem [shape: f32[1,128], index: 6, kind: input, shape index: {}]   ;;  %s824_s7 = inlined_call_operand.hbm [shape: f32[8,128], index: 7, kind: output, shape index: {}]  }
   0x1   :  { %13 = vsyncpa [#allocation6], 0 }
   0x2   :  { %14 = vsyncpa [#allocation9], 0 }
   0x3   :  { %15 = vsyncpa [#allocation4], 0  ;;  %s705_s24 = smov [#allocation5]  }
   0x4   :  { %s31_s25 = sshll.u32 %s705_s24, 4  ;;  %s32_s25 = int_to_ptr.vmem [resolvable:$true] %s31_s25 }
   0x5   :  { %s605_s26 = scalar_lea.vmem %s32_s25, 1024  ;;  %p610_p1 = scmp.lt.s32.totalorder %s32_s25, %s32_s25 }
   0x6   :  { %p606_p0 = scmp.ne.s32.totalorder %s32_s25, %s605_s26  ;;  %p611_p2 = scmp.lt.s32.totalorder %s605_s26, %s605_s26 }
   0x8   :  { %p612_p3 = por %p611_p2, %p610_p1 }
   0xa   :  { %p613_p4 = pnand %p612_p3, %p606_p0 }
   0xc   :  { %616 = shalt.err (!%p613_p4)
}
   0xd   :  { %s706_s27 = smov 64   ;;  %s707_s28 = smov 4  }
   0xe   :  { %37 = dma.hbm_to_vmem [thread:$0]  %s818_s1, 1024, %s32_s25, [#allocation6], %s706_s27, %s706_s27, %s707_s28  }
   0xf   :  { %s708_s8 = smov [#allocation2]   ;;  %s709_s10 = smov [#allocation7]  }
  0x10   :  { %s22_s9 = sshll.u32 %s708_s8, 4  ;;  %s45_s11 = sshll.u32 %s709_s10, 4  ;;  %s23_s9 = int_to_ptr.vmem [resolvable:$true] %s22_s9  ;;  %s46_s11 = int_to_ptr.vmem [resolvable:$true] %s45_s11 }
  0x11   :  { %s625_s12 = scalar_lea.vmem %s23_s9, 128  ;;  %p630_p6 = scmp.lt.s32.totalorder %s23_s9, %s23_s9 }
  0x12   :  { %p626_p5 = scmp.ne.s32.totalorder %s23_s9, %s625_s12  ;;  %p631_p7 = scmp.lt.s32.totalorder %s625_s12, %s625_s12 }
  0x14   :  { %p632_p8 = por %p631_p7, %p630_p6 }
  0x16   :  { %p633_p9 = pnand %p632_p8, %p626_p5 }
  0x18   :  { %636 = shalt.err (!%p633_p9)
}
  0x19   :  { %25 = dma.hbm_to_vmem [thread:$0]  %s817_s0, 128, %s23_s9, [#allocation3]  }
  0x1a   :  { %s645_s15 = scalar_lea.vmem %s46_s11, 1024  ;;  %p650_p11 = scmp.lt.s32.totalorder %s46_s11, %s46_s11 }
  0x1b   :  { %p646_p10 = scmp.ne.s32.totalorder %s46_s11, %s645_s15  ;;  %p651_p12 = scmp.lt.s32.totalorder %s645_s15, %s645_s15 }
  0x1d   :  { %p652_p13 = por %p651_p12, %p650_p11 }
  0x1f   :  { %p653_p0 = pnand %p652_p13, %p646_p10 }
  0x21   :  { %656 = shalt.err (!%p653_p0)
}
  0x22   :  { %51 = dma.hbm_to_vmem [thread:$0]  %s820_s3, 1024, %s46_s11, [#allocation6], %s706_s27, %s706_s27, %s707_s28  }
  0x23   :  { %s710_s17 = smov [#allocation8]  }
  0x24   :  { %s59_s18 = sshll.u32 %s710_s17, 4  ;;  %s60_s18 = int_to_ptr.vmem [resolvable:$true] %s59_s18 }
  0x25   :  { %s665_s19 = scalar_lea.vmem %s60_s18, 1024  ;;  %p670_p2 = scmp.lt.s32.totalorder %s60_s18, %s60_s18 }
  0x26   :  { %p666_p1 = scmp.ne.s32.totalorder %s60_s18, %s665_s19  ;;  %p671_p3 = scmp.lt.s32.totalorder %s665_s19, %s665_s19 }
  0x28   :  { %p672_p4 = por %p671_p3, %p670_p2 }
  0x2a   :  { %p673_p5 = pnand %p672_p4, %p666_p1 }
  0x2c   :  { %676 = shalt.err (!%p673_p5)
}
  0x2d   :  { %65 = dma.hbm_to_vmem [thread:$0]  %s822_s5, 1024, %s60_s18, [#allocation9], %s706_s27, %s706_s27, %s707_s28  }
  0x2e   :  { %697 = dma.done.wait [#allocation3], 128  }
  0x2f   :  { %698 = vsyncadd [#allocation3], 4294967168 }
  0x30   :  { %699 = dma.done.wait [#allocation6], 2048  }
  0x31   :  { %700 = vsyncadd [#allocation6], 4294965248 }
  0x32   :  { %701 = dma.done.wait [#allocation9], 1024  }
  0x33   :  { %702 = vsyncadd [#allocation9], 4294966272  ;;  %v711_v0 = vmov 0.0   ;;  %vm712_vm0 = vmmov 0   ;;  %v569_v1 = vld [vmem:[#allocation5 + $0x38] sm:$0xff]   ;;  %v570_v2 = vld [vmem:[#allocation5 + $0x30] sm:$0xff]  }
  0x34   :  { %500 = vmatprep.subr.bf16.mxu0 %v711_v0  ;;  %516 = vmatprep.mubr.msk.bf16.mxu0 %vm712_vm0, %v711_v0  ;;  %v571_v3 = vld [vmem:[#allocation5 + $0x28] sm:$0xff]   ;;  %v577_v4 = vld [vmem:[#allocation7 + $0x38] sm:$0xff]   ;;  %v572_v5 = vld [vmem:[#allocation5 + $0x20] sm:$0xff]   ;;  %s713_s24 = smov [#allocation10]  }
  0x35   :  { %520 = vmatprep.subr.bf16.mxu1 %v711_v0  ;;  %536 = vmatprep.mubr.msk.bf16.mxu1 %vm712_vm0, %v711_v0  ;;  %v578_v6 = vld [vmem:[#allocation7 + $0x30] sm:$0xff]   ;;  %v573_v7 = vld [vmem:[#allocation5 + $0x18] sm:$0xff]   ;;  %v575_v9 = vld [vmem:[#allocation5 + $0x8] sm:$0xff]   ;;  %s435_s25 = sshll.u32 %s713_s24, 4  ;;  %s436_s25 = int_to_ptr.vmem [resolvable:$true] %s435_s25 }
  0x36   :  { %501 = vmatpush3.bf16.msra.mxu0 %v569_v1  ;;  %521 = vmatpush3.bf16.msra.mxu1 %v577_v4  ;;  %v574_v8 = vld [vmem:[#allocation5 + $0x10] sm:$0xff]   ;;  %v576_v10 = vld [vmem:[#allocation5] sm:$0xff]   ;;  %v81_v11 = vld [vmem:[#allocation2] sm:$0xff]  ;;  %p682_p7 = scmp.lt.s32.totalorder %s436_s25, %s436_s25 }
  0x37   :  { %502 = vmatprep.subr.bf16.mxu0 %v711_v0  ;;  %522 = vmatprep.subr.bf16.mxu1 %v711_v0  ;;  %v99_v12 = vpack.c.bf16 %v81_v11, %v81_v11  ;;  %v579_v13 = vld [vmem:[#allocation7 + $0x28] sm:$0xff]   ;;  %v580_v14 = vld [vmem:[#allocation7 + $0x20] sm:$0xff]   ;;  %v581_v15 = vld [vmem:[#allocation7 + $0x18] sm:$0xff]  }
  0x38   :  { %v582_v16 = vld [vmem:[#allocation7 + $0x10] sm:$0xff]   ;;  %v583_v17 = vld [vmem:[#allocation7 + $0x8] sm:$0xff]   ;;  %v584_v18 = vld [vmem:[#allocation7] sm:$0xff]  }
  0x39   :  { %v585_v19 = vld [vmem:[#allocation8 + $0x38] sm:$0xff]   ;;  %v586_v20 = vld [vmem:[#allocation8 + $0x30] sm:$0xff]   ;;  %v587_v33 = vld [vmem:[#allocation8 + $0x28] sm:$0xff]  }
  0x3a   :  { %503 = vmatpush3.bf16.msra.mxu0 %v570_v2  ;;  %523 = vmatpush3.bf16.msra.mxu1 %v578_v6  ;;  %v446_v21 = vld [vmem:[%s819_s2] ss:$0 sm:$0xff]  ;;  %v588_v34 = vld [vmem:[#allocation8 + $0x20] sm:$0xff]   ;;  %v590_v36 = vld [vmem:[#allocation8 + $0x10] sm:$0xff]  }
  0x3b   :  { %504 = vmatprep.subr.bf16.mxu0 %v711_v0  ;;  %524 = vmatprep.subr.bf16.mxu1 %v711_v0  ;;  %v589_v35 = vld [vmem:[#allocation8 + $0x18] sm:$0xff]   ;;  %v591_v37 = vld [vmem:[#allocation8 + $0x8] sm:$0xff]   ;;  %v592_v38 = vld [vmem:[#allocation8] sm:$0xff]  }
  0x3c   :  { %v455_v39 = vld [vmem:[%s821_s4] ss:$0 sm:$0xff]  ;;  %s677_s4 = scalar_lea.vmem %s436_s25, 128 }
  0x3d   :  { %v464_v51 = vld [vmem:[%s823_s6] ss:$0 sm:$0xff]  ;;  %p678_p6 = scmp.ne.s32.totalorder %s436_s25, %s677_s4  ;;  %p683_p8 = scmp.lt.s32.totalorder %s677_s4, %s677_s4 }
  0x3e   :  { %505 = vmatpush3.bf16.msra.mxu0 %v571_v3  ;;  %525 = vmatpush3.bf16.msra.mxu1 %v579_v13 }
  0x3f   :  { %506 = vmatprep.subr.bf16.mxu0 %v711_v0  ;;  %526 = vmatprep.subr.bf16.mxu1 %v711_v0  ;;  %p684_p9 = por %p683_p8, %p682_p7 }
  0x41   :  { %p685_p10 = pnand %p684_p9, %p678_p6 }
  0x42   :  { %507 = vmatpush3.bf16.msra.mxu0 %v572_v5  ;;  %527 = vmatpush3.bf16.msra.mxu1 %v580_v14 }
  0x43   :  { %508 = vmatprep.subr.bf16.mxu0 %v711_v0  ;;  %528 = vmatprep.subr.bf16.mxu1 %v711_v0 }
  0x46   :  { %509 = vmatpush3.bf16.msra.mxu0 %v573_v7  ;;  %529 = vmatpush3.bf16.msra.mxu1 %v581_v15 }
  0x47   :  { %510 = vmatprep.subr.bf16.mxu0 %v711_v0  ;;  %530 = vmatprep.subr.bf16.mxu1 %v711_v0 }
  0x4a   :  { %511 = vmatpush3.bf16.msra.mxu0 %v574_v8  ;;  %531 = vmatpush3.bf16.msra.mxu1 %v582_v16 }
  0x4b   :  { %512 = vmatprep.subr.bf16.mxu0 %v711_v0  ;;  %532 = vmatprep.subr.bf16.mxu1 %v711_v0 }
  0x4e   :  { %513 = vmatpush3.bf16.msra.mxu0 %v575_v9  ;;  %533 = vmatpush3.bf16.msra.mxu1 %v583_v17 }
  0x4f   :  { %514 = vmatprep.subr.bf16.mxu0 %v711_v0  ;;  %534 = vmatprep.subr.bf16.mxu1 %v711_v0 }
  0x52   :  { %515 = vmatpush3.bf16.msra.mxu0 %v576_v10  ;;  %535 = vmatpush3.bf16.msra.mxu1 %v584_v18 }
  0x53   :  { %540 = vmatprep.subr.bf16.mxu0 %v711_v0 }
  0x55   :  { %517 = vmatmul.mubr.bf16.vlgmr.msra.gmra.mxu0 %v99_v12 }
  0x56   :  { %556 = vmatprep.mubr.msk.bf16.mxu0 %vm712_vm0, %v711_v0  ;;  %541 = vmatpush3.bf16.msra.mxu0 %v585_v19 }
  0x57   :  { %542 = vmatprep.subr.bf16.mxu0 %v711_v0 }
  0x5a   :  { %543 = vmatpush3.bf16.msra.mxu0 %v586_v20 }
  0x5b   :  { %544 = vmatprep.subr.bf16.mxu0 %v711_v0 }
  0x5e   :  { %545 = vmatpush3.bf16.msra.mxu0 %v587_v33 }
  0x5f   :  { %546 = vmatprep.subr.bf16.mxu0 %v711_v0 }
  0x62   :  { %547 = vmatpush3.bf16.msra.mxu0 %v588_v34 }
  0x63   :  { %548 = vmatprep.subr.bf16.mxu0 %v711_v0 }
  0x66   :  { %549 = vmatpush3.bf16.msra.mxu0 %v589_v35 }
  0x67   :  { %550 = vmatprep.subr.bf16.mxu0 %v711_v0 }
  0x6a   :  { %551 = vmatpush3.bf16.msra.mxu0 %v590_v36 }
  0x6b   :  { %552 = vmatprep.subr.bf16.mxu0 %v711_v0 }
  0x6e   :  { %553 = vmatpush3.bf16.msra.mxu0 %v591_v37 }
  0x6f   :  { %554 = vmatprep.subr.bf16.mxu0 %v711_v0 }
  0x72   :  { %555 = vmatpush3.bf16.msra.mxu0 %v592_v38 }
 0x115   :  { %v188_v22 = vpop.f32.mrf.mxu0 }
 0x116   :  { %v189_v23 = vadd.f32 %v446_v21, %v188_v22 }
 0x117   :  { %v518_v24 = vpop.f32.mrf.mxu0 }
 0x118   :  { %v195_v25 = vmul.f32 0.70710677, %v189_v23  ;;  %v194_v29 = vmul.f32 0.5, %v189_v23 }
 0x119   :  { %v191_v26 = vpop.f32.mrf.mxu0 }
 0x11a   :  { %593 = verf.f32 %v195_v25 }
 0x11b   :  { %v519_v27 = vpop.f32.mrf.mxu0 }
 0x127   :  { %v594_v28 = vpop.eup %593 }
 0x128   :  { %v197_v30 = vadd.f32 1.0, %v594_v28 }
 0x12a   :  { %v198_v31 = vmul.f32 %v197_v30, %v194_v29 }
 0x12c   :  { %v216_v32 = vpack.c.bf16 %v198_v31, %v198_v31 }
 0x12e   :  { %537 = vmatmul.mubr.bf16.vlgmr.msra.gmra.mxu1 %v216_v32 }
 0x1ee   :  { %v305_v40 = vpop.f32.mrf.mxu1 }
 0x1ef   :  { %v306_v41 = vadd.f32 %v455_v39, %v305_v40 }
 0x1f0   :  { %v538_v42 = vpop.f32.mrf.mxu1 }
 0x1f1   :  { %v312_v43 = vmul.f32 0.70710677, %v306_v41  ;;  %v311_v47 = vmul.f32 0.5, %v306_v41 }
 0x1f2   :  { %v308_v44 = vpop.f32.mrf.mxu1 }
 0x1f3   :  { %595 = verf.f32 %v312_v43 }
 0x1f4   :  { %v539_v45 = vpop.f32.mrf.mxu1 }
 0x200   :  { %v596_v46 = vpop.eup %595 }
 0x201   :  { %v314_v48 = vadd.f32 1.0, %v596_v46 }
 0x203   :  { %v315_v49 = vmul.f32 %v314_v48, %v311_v47 }
 0x205   :  { %v333_v50 = vpack.c.bf16 %v315_v49, %v315_v49 }
 0x207   :  { %557 = vmatmul.mubr.bf16.vlgmr.msra.gmra.mxu0 %v333_v50 }
 0x2c7   :  { %v422_v52 = vpop.f32.mrf.mxu0 }
 0x2c8   :  { %v423_v53 = vadd.f32 %v464_v51, %v422_v52 }
 0x2c9   :  { %v558_v54 = vpop.f32.mrf.mxu0 }
 0x2ca   :  { %428 = vst [vmem:[#allocation10] sm:$0xff] %v423_v53 }
 0x2cb   :  { %v425_v55 = vpop.f32.mrf.mxu0 }
 0x2cc   :  { %688 = shalt.err (!%p685_p10)
}
 0x2cd   :  { %438 = dma.vmem_to_hbm [thread:$0]  %s436_s25, 128, %s824_s7, [#allocation4]   ;;  %v559_v56 = vpop.f32.mrf.mxu0 }
 0x2ce   :  { %703 = dma.done.wait [#allocation4], 128  }
 0x2cf   :  { %704 = vsyncadd [#allocation4], 4294967168 }
 0x2d0   :  { %442 = vsyncpa [#allocation3], 1 }
 0x2d1   :  { %443 = vsyncpa [#allocation6], 1 }
 0x2d2   :  { %444 = vsyncpa [#allocation9], 1 }
 0x2d3   :  { %445 = vsyncpa [#allocation4], 1 }

// kernel: tpu_custom_call.1
= control target key start
LH: loop header
LB: loop body
LE: loop exit
PB: predicated region body
PF: predicated region fallthrough
CT: control target
= control target key end

     0   :  { %12 = vsyncpa [#allocation3], 0  ;;  %s817_s0 = inlined_call_operand.hbm [shape: f32[8,128], index: 0, kind: input, shape index: {}]   ;;  %s818_s1 = inlined_call_operand.hbm [shape: bf16[128,128], index: 1, kind: input, shape index: {}]   ;;  %s819_s2 = inlined_call_operand.vmem [shape: f32[1,128], index: 2, kind: input, shape index: {}]   ;;  %s820_s3 = inlined_call_operand.hbm [shape: bf16[128,128], index: 3, kind: input, shape index: {}]   ;;  %s821_s4 = inlined_call_operand.vmem [shape: f32[1,128], index: 4, kind: input, shape index: {}]   ;;  %s822_s5 = inlined_call_operand.hbm [shape: bf16[128,128], index: 5, kind: input, shape index: {}]   ;;  %s823_s6 = inlined_call_operand.vmem [shape: f32[1,128], index: 6, kind: input, shape index: {}]   ;;  %s824_s7 = inlined_call_operand.hbm [shape: f32[8,128], index: 7, kind: output, shape index: {}]  }
   0x1   :  { %13 = vsyncpa [#allocation6], 0 }
   0x2   :  { %14 = vsyncpa [#allocation9], 0 }
   0x3   :  { %15 = vsyncpa [#allocation4], 0  ;;  %s705_s24 = smov [#allocation5]  }
   0x4   :  { %s31_s25 = sshll.u32 %s705_s24, 4  ;;  %s32_s25 = int_to_ptr.vmem [resolvable:$true] %s31_s25 }
   0x5   :  { %s605_s26 = scalar_lea.vmem %s32_s25, 1024  ;;  %p610_p1 = scmp.lt.s32.totalorder %s32_s25, %s32_s25 }
   0x6   :  { %p606_p0 = scmp.ne.s32.totalorder %s32_s25, %s605_s26  ;;  %p611_p2 = scmp.lt.s32.totalorder %s605_s26, %s605_s26 }
   0x8   :  { %p612_p3 = por %p611_p2, %p610_p1 }
   0xa   :  { %p613_p4 = pnand %p612_p3, %p606_p0 }
   0xc   :  { %616 = shalt.err (!%p613_p4)
}
   0xd   :  { %s706_s27 = smov 64   ;;  %s707_s28 = smov 4  }
   0xe   :  { %37 = dma.hbm_to_vmem [thread:$0]  %s818_s1, 1024, %s32_s25, [#allocation6], %s706_s27, %s706_s27, %s707_s28  }
   0xf   :  { %s708_s8 = smov [#allocation2]   ;;  %s709_s10 = smov [#allocation7]  }
  0x10   :  { %s22_s9 = sshll.u32 %s708_s8, 4  ;;  %s45_s11 = sshll.u32 %s709_s10, 4  ;;  %s23_s9 = int_to_ptr.vmem [resolvable:$true] %s22_s9  ;;  %s46_s11 = int_to_ptr.vmem [resolvable:$true] %s45_s11 }
  0x11   :  { %s625_s12 = scalar_lea.vmem %s23_s9, 128  ;;  %p630_p6 = scmp.lt.s32.totalorder %s23_s9, %s23_s9 }
  0x12   :  { %p626_p5 = scmp.ne.s32.totalorder %s23_s9, %s625_s12  ;;  %p631_p7 = scmp.lt.s32.totalorder %s625_s12, %s625_s12 }
  0x14   :  { %p632_p8 = por %p631_p7, %p630_p6 }
  0x16   :  { %p633_p9 = pnand %p632_p8, %p626_p5 }
  0x18   :  { %636 = shalt.err (!%p633_p9)
}
  0x19   :  { %25 = dma.hbm_to_vmem [thread:$0]  %s817_s0, 128, %s23_s9, [#allocation3]  }
  0x1a   :  { %s645_s15 = scalar_lea.vmem %s46_s11, 1024  ;;  %p650_p11 = scmp.lt.s32.totalorder %s46_s11, %s46_s11 }
  0x1b   :  { %p646_p10 = scmp.ne.s32.totalorder %s46_s11, %s645_s15  ;;  %p651_p12 = scmp.lt.s32.totalorder %s645_s15, %s645_s15 }
  0x1d   :  { %p652_p13 = por %p651_p12, %p650_p11 }
  0x1f   :  { %p653_p0 = pnand %p652_p13, %p646_p10 }
  0x21   :  { %656 = shalt.err (!%p653_p0)
}
  0x22   :  { %51 = dma.hbm_to_vmem [thread:$0]  %s820_s3, 1024, %s46_s11, [#allocation6], %s706_s27, %s706_s27, %s707_s28  }
  0x23   :  { %s710_s17 = smov [#allocation8]  }
  0x24   :  { %s59_s18 = sshll.u32 %s710_s17, 4  ;;  %s60_s18 = int_to_ptr.vmem [resolvable:$true] %s59_s18 }
  0x25   :  { %s665_s19 = scalar_lea.vmem %s60_s18, 1024  ;;  %p670_p2 = scmp.lt.s32.totalorder %s60_s18, %s60_s18 }
  0x26   :  { %p666_p1 = scmp.ne.s32.totalorder %s60_s18, %s665_s19  ;;  %p671_p3 = scmp.lt.s32.totalorder %s665_s19, %s665_s19 }
  0x28   :  { %p672_p4 = por %p671_p3, %p670_p2 }
  0x2a   :  { %p673_p5 = pnand %p672_p4, %p666_p1 }
  0x2c   :  { %676 = shalt.err (!%p673_p5)
}
  0x2d   :  { %65 = dma.hbm_to_vmem [thread:$0]  %s822_s5, 1024, %s60_s18, [#allocation9], %s706_s27, %s706_s27, %s707_s28  }
  0x2e   :  { %697 = dma.done.wait [#allocation3], 128  }
  0x2f   :  { %698 = vsyncadd [#allocation3], 4294967168 }
  0x30   :  { %699 = dma.done.wait [#allocation6], 2048  }
  0x31   :  { %700 = vsyncadd [#allocation6], 4294965248 }
  0x32   :  { %701 = dma.done.wait [#allocation9], 1024  }
  0x33   :  { %702 = vsyncadd [#allocation9], 4294966272  ;;  %v711_v0 = vmov 0.0   ;;  %vm712_vm0 = vmmov 0   ;;  %v569_v1 = vld [vmem:[#allocation5 + $0x38] sm:$0xff]   ;;  %v570_v2 = vld [vmem:[#allocation5 + $0x30] sm:$0xff]  }
  0x34   :  { %500 = vmatprep.subr.bf16.mxu0 %v711_v0  ;;  %516 = vmatprep.mubr.msk.bf16.mxu0 %vm712_vm0, %v711_v0  ;;  %v571_v3 = vld [vmem:[#allocation5 + $0x28] sm:$0xff]   ;;  %v577_v4 = vld [vmem:[#allocation7 + $0x38] sm:$0xff]   ;;  %v572_v5 = vld [vmem:[#allocation5 + $0x20] sm:$0xff]   ;;  %s713_s24 = smov [#allocation10]  }
  0x35   :  { %520 = vmatprep.subr.bf16.mxu1 %v711_v0  ;;  %536 = vmatprep.mubr.msk.bf16.mxu1 %vm712_vm0, %v711_v0  ;;  %v578_v6 = vld [vmem:[#allocation7 + $0x30] sm:$0xff]   ;;  %v573_v7 = vld [vmem:[#allocation5 + $0x18] sm:$0xff]   ;;  %v575_v9 = vld [vmem:[#allocation5 + $0x8] sm:$0xff]   ;;  %s435_s25 = sshll.u32 %s713_s24, 4  ;;  %s436_s25 = int_to_ptr.vmem [resolvable:$true] %s435_s25 }
  0x36   :  { %501 = vmatpush3.bf16.msra.mxu0 %v569_v1  ;;  %521 = vmatpush3.bf16.msra.mxu1 %v577_v4  ;;  %v574_v8 = vld [vmem:[#allocation5 + $0x10] sm:$0xff]   ;;  %v576_v10 = vld [vmem:[#allocation5] sm:$0xff]   ;;  %v81_v11 = vld [vmem:[#allocation2] sm:$0xff]  ;;  %p682_p7 = scmp.lt.s32.totalorder %s436_s25, %s436_s25 }
  0x37   :  { %502 = vmatprep.subr.bf16.mxu0 %v711_v0  ;;  %522 = vmatprep.subr.bf16.mxu1 %v711_v0  ;;  %v99_v12 = vpack.c.bf16 %v81_v11, %v81_v11  ;;  %v579_v13 = vld [vmem:[#allocation7 + $0x28] sm:$0xff]   ;;  %v580_v14 = vld [vmem:[#allocation7 + $0x20] sm:$0xff]   ;;  %v581_v15 = vld [vmem:[#allocation7 + $0x18] sm:$0xff]  }
  0x38   :  { %v582_v16 = vld [vmem:[#allocation7 + $0x10] sm:$0xff]   ;;  %v583_v17 = vld [vmem:[#allocation7 + $0x8] sm:$0xff]   ;;  %v584_v18 = vld [vmem:[#allocation7] sm:$0xff]  }
  0x39   :  { %v585_v19 = vld [vmem:[#allocation8 + $0x38] sm:$0xff]   ;;  %v586_v20 = vld [vmem:[#allocation8 + $0x30] sm:$0xff]   ;;  %v587_v33 = vld [vmem:[#allocation8 + $0x28] sm:$0xff]  }
  0x3a   :  { %503 = vmatpush3.bf16.msra.mxu0 %v570_v2  ;;  %523 = vmatpush3.bf16.msra.mxu1 %v578_v6  ;;  %v446_v21 = vld [vmem:[%s819_s2] ss:$0 sm:$0xff]  ;;  %v588_v34 = vld [vmem:[#allocation8 + $0x20] sm:$0xff]   ;;  %v590_v36 = vld [vmem:[#allocation8 + $0x10] sm:$0xff]  }
  0x3b   :  { %504 = vmatprep.subr.bf16.mxu0 %v711_v0  ;;  %524 = vmatprep.subr.bf16.mxu1 %v711_v0  ;;  %v589_v35 = vld [vmem:[#allocation8 + $0x18] sm:$0xff]   ;;  %v591_v37 = vld [vmem:[#allocation8 + $0x8] sm:$0xff]   ;;  %v592_v38 = vld [vmem:[#allocation8] sm:$0xff]  }
  0x3c   :  { %v455_v39 = vld [vmem:[%s821_s4] ss:$0 sm:$0xff]  ;;  %s677_s4 = scalar_lea.vmem %s436_s25, 128 }
  0x3d   :  { %v464_v51 = vld [vmem:[%s823_s6] ss:$0 sm:$0xff]  ;;  %p678_p6 = scmp.ne.s32.totalorder %s436_s25, %s677_s4  ;;  %p683_p8 = scmp.lt.s32.totalorder %s677_s4, %s677_s4 }
  0x3e   :  { %505 = vmatpush3.bf16.msra.mxu0 %v571_v3  ;;  %525 = vmatpush3.bf16.msra.mxu1 %v579_v13 }
  0x3f   :  { %506 = vmatprep.subr.bf16.mxu0 %v711_v0  ;;  %526 = vmatprep.subr.bf16.mxu1 %v711_v0  ;;  %p684_p9 = por %p683_p8, %p682_p7 }
  0x41   :  { %p685_p10 = pnand %p684_p9, %p678_p6 }
  0x42   :  { %507 = vmatpush3.bf16.msra.mxu0 %v572_v5  ;;  %527 = vmatpush3.bf16.msra.mxu1 %v580_v14 }
  0x43   :  { %508 = vmatprep.subr.bf16.mxu0 %v711_v0  ;;  %528 = vmatprep.subr.bf16.mxu1 %v711_v0 }
  0x46   :  { %509 = vmatpush3.bf16.msra.mxu0 %v573_v7  ;;  %529 = vmatpush3.bf16.msra.mxu1 %v581_v15 }
  0x47   :  { %510 = vmatprep.subr.bf16.mxu0 %v711_v0  ;;  %530 = vmatprep.subr.bf16.mxu1 %v711_v0 }
  0x4a   :  { %511 = vmatpush3.bf16.msra.mxu0 %v574_v8  ;;  %531 = vmatpush3.bf16.msra.mxu1 %v582_v16 }
  0x4b   :  { %512 = vmatprep.subr.bf16.mxu0 %v711_v0  ;;  %532 = vmatprep.subr.bf16.mxu1 %v711_v0 }
  0x4e   :  { %513 = vmatpush3.bf16.msra.mxu0 %v575_v9  ;;  %533 = vmatpush3.bf16.msra.mxu1 %v583_v17 }
  0x4f   :  { %514 = vmatprep.subr.bf16.mxu0 %v711_v0  ;;  %534 = vmatprep.subr.bf16.mxu1 %v711_v0 }
  0x52   :  { %515 = vmatpush3.bf16.msra.mxu0 %v576_v10  ;;  %535 = vmatpush3.bf16.msra.mxu1 %v584_v18 }
  0x53   :  { %540 = vmatprep.subr.bf16.mxu0 %v711_v0 }
  0x55   :  { %517 = vmatmul.mubr.bf16.vlgmr.msra.gmra.mxu0 %v99_v12 }
  0x56   :  { %556 = vmatprep.mubr.msk.bf16.mxu0 %vm712_vm0, %v711_v0  ;;  %541 = vmatpush3.bf16.msra.mxu0 %v585_v19 }
  0x57   :  { %542 = vmatprep.subr.bf16.mxu0 %v711_v0 }
  0x5a   :  { %543 = vmatpush3.bf16.msra.mxu0 %v586_v20 }
  0x5b   :  { %544 = vmatprep.subr.bf16.mxu0 %v711_v0 }
  0x5e   :  { %545 = vmatpush3.bf16.msra.mxu0 %v587_v33 }
  0x5f   :  { %546 = vmatprep.subr.bf16.mxu0 %v711_v0 }
  0x62   :  { %547 = vmatpush3.bf16.msra.mxu0 %v588_v34 }
  0x63   :  { %548 = vmatprep.subr.bf16.mxu0 %v711_v0 }
  0x66   :  { %549 = vmatpush3.bf16.msra.mxu0 %v589_v35 }
  0x67   :  { %550 = vmatprep.subr.bf16.mxu0 %v711_v0 }
  0x6a   :  { %551 = vmatpush3.bf16.msra.mxu0 %v590_v36 }
  0x6b   :  { %552 = vmatprep.subr.bf16.mxu0 %v711_v0 }
  0x6e   :  { %553 = vmatpush3.bf16.msra.mxu0 %v591_v37 }
  0x6f   :  { %554 = vmatprep.subr.bf16.mxu0 %v711_v0 }
  0x72   :  { %555 = vmatpush3.bf16.msra.mxu0 %v592_v38 }
 0x115   :  { %v188_v22 = vpop.f32.mrf.mxu0 }
 0x116   :  { %v189_v23 = vadd.f32 %v446_v21, %v188_v22 }
 0x117   :  { %v518_v24 = vpop.f32.mrf.mxu0 }
 0x118   :  { %v195_v25 = vmul.f32 0.70710677, %v189_v23  ;;  %v194_v29 = vmul.f32 0.5, %v189_v23 }
 0x119   :  { %v191_v26 = vpop.f32.mrf.mxu0 }
 0x11a   :  { %593 = verf.f32 %v195_v25 }
 0x11b   :  { %v519_v27 = vpop.f32.mrf.mxu0 }
 0x127   :  { %v594_v28 = vpop.eup %593 }
 0x128   :  { %v197_v30 = vadd.f32 1.0, %v594_v28 }
 0x12a   :  { %v198_v31 = vmul.f32 %v197_v30, %v194_v29 }
 0x12c   :  { %v216_v32 = vpack.c.bf16 %v198_v31, %v198_v31 }
 0x12e   :  { %537 = vmatmul.mubr.bf16.vlgmr.msra.gmra.mxu1 %v216_v32 }
 0x1ee   :  { %v305_v40 = vpop.f32.mrf.mxu1 }
 0x1ef   :  { %v306_v41 = vadd.f32 %v455_v39, %v305_v40 }
 0x1f0   :  { %v538_v42 = vpop.f32.mrf.mxu1 }
 0x1f1   :  { %v312_v43 = vmul.f32 0.70710677, %v306_v41  ;;  %v311_v47 = vmul.f32 0.5, %v306_v41 }
 0x1f2   :  { %v308_v44 = vpop.f32.mrf.mxu1 }
 0x1f3   :  { %595 = verf.f32 %v312_v43 }
 0x1f4   :  { %v539_v45 = vpop.f32.mrf.mxu1 }
 0x200   :  { %v596_v46 = vpop.eup %595 }
 0x201   :  { %v314_v48 = vadd.f32 1.0, %v596_v46 }
 0x203   :  { %v315_v49 = vmul.f32 %v314_v48, %v311_v47 }
 0x205   :  { %v333_v50 = vpack.c.bf16 %v315_v49, %v315_v49 }
 0x207   :  { %557 = vmatmul.mubr.bf16.vlgmr.msra.gmra.mxu0 %v333_v50 }
 0x2c7   :  { %v422_v52 = vpop.f32.mrf.mxu0 }
 0x2c8   :  { %v423_v53 = vadd.f32 %v464_v51, %v422_v52 }
 0x2c9   :  { %v558_v54 = vpop.f32.mrf.mxu0 }
 0x2ca   :  { %428 = vst [vmem:[#allocation10] sm:$0xff] %v423_v53 }
 0x2cb   :  { %v425_v55 = vpop.f32.mrf.mxu0 }
 0x2cc   :  { %688 = shalt.err (!%p685_p10)
}
 0x2cd   :  { %438 = dma.vmem_to_hbm [thread:$0]  %s436_s25, 128, %s824_s7, [#allocation4]   ;;  %v559_v56 = vpop.f32.mrf.mxu0 }
 0x2ce   :  { %703 = dma.done.wait [#allocation4], 128  }
 0x2cf   :  { %704 = vsyncadd [#allocation4], 4294967168 }
 0x2d0   :  { %442 = vsyncpa [#allocation3], 1 }
 0x2d1   :  { %443 = vsyncpa [#allocation6], 1 }
 0x2d2   :  { %444 = vsyncpa [#allocation9], 1 }
 0x2d3   :  { %445 = vsyncpa [#allocation4], 1 }

</bundles_post_ra>
